<compile_context>
chip_gen: v7x
topology: tpu7x:2x2x1
jax: 0.10.0
libtpu: 0.0.40
codegen_flags: <defaults>
</compile_context>

<pallas_src>
import functools

import jax
import jax.numpy as jnp
from jax.experimental import pallas as pl
from jax.experimental.pallas import tpu as pltpu


NEG_SLOPE = 0.01      # PyTorch nn.LeakyReLU default
HID = 128             # per-branch hidden width
FUSED = 2 * HID       # actor+critic fused hidden width (256)
OUT_PAD = 128         # lane-dense fused output width: [policy | value | zero pad]
MAX_TB = 256          # max batch tile per grid step


def _round_up(x, m):
    return (x + m - 1) // m * m


def _leaky_relu(x):
    # slope < 1  =>  max(x, slope*x) == leaky_relu(x)
    return jnp.maximum(x, NEG_SLOPE * x)


@functools.lru_cache(maxsize=1)
def _mxu_is_128x128():
    """True on TPU generations with a 128x128 MXU (v2-v5); v6e/v7x are 256x256."""
    try:
        kind = jax.devices()[0].device_kind.lower()
    except Exception:
        return False
    return any(t in kind for t in ("v2", "v3", "v4", "v5"))


# ------------------------------- kernel -------------------------------------

def _fused_actor_critic_kernel(x_ref, w_ref, b_ref, out_ref, *, d_pad, split_layer2):
    """x_ref: [TB, d_pad] bf16, w_ref: [d_pad+512, 256] bf16, b_ref: [8,256] f32."""
    bias = b_ref[...]                        # rows 0..2 used: b1 | b2 | b3
    x = x_ref[...]                           # bf16 activations

    w2_lo = d_pad
    w3_lo = d_pad + FUSED

    # ---- layer 1: [TB, d_pad] @ [d_pad, 256]   (actor cols 0:128, critic 128:256)
    h = jnp.dot(x, w_ref[0:d_pad, :], preferred_element_type=jnp.float32) + bias[0]
    h = _leaky_relu(h).astype(jnp.bfloat16)

    if split_layer2:
        # v5e path: two 128x128 dots (the block-diagonal zeros would waste MXU tiles)
        ha = (jnp.dot(h[:, :HID], w_ref[w2_lo:w2_lo + HID, :HID],
                      preferred_element_type=jnp.float32) + bias[1, :HID])
        hc = (jnp.dot(h[:, HID:], w_ref[w2_lo + HID:w2_lo + FUSED, HID:],
                      preferred_element_type=jnp.float32) + bias[1, HID:])
        ha = _leaky_relu(ha).astype(jnp.bfloat16)
        hc = _leaky_relu(hc).astype(jnp.bfloat16)
        # layer 3: block-diagonal split into its two K=128 halves, summed
        out = (jnp.dot(ha, w_ref[w3_lo:w3_lo + HID, :OUT_PAD],
                       preferred_element_type=jnp.float32)
               + jnp.dot(hc, w_ref[w3_lo + HID:w3_lo + FUSED, :OUT_PAD],
                         preferred_element_type=jnp.float32)
               + bias[2, :OUT_PAD])
    else:
        # v6e/v7x path: fused block-diagonal [256, 256] (single 256x256 MXU pass)
        h = jnp.dot(h, w_ref[w2_lo:w3_lo, :], preferred_element_type=jnp.float32) + bias[1]
        h = _leaky_relu(h).astype(jnp.bfloat16)
        # layer 3: block-diagonal [256, 128] -> lane-dense fused output
        out = (jnp.dot(h, w_ref[w3_lo:w3_lo + FUSED, :OUT_PAD],
                       preferred_element_type=jnp.float32) + bias[2, :OUT_PAD])

    out_ref[...] = out.astype(out_ref.dtype)


# ------------------------------- wrapper ------------------------------------

@functools.partial(jax.jit, static_argnames=("act_dim", "rew_dim", "split_layer2"))
def _forward_impl(state, preference, w_blob, b_blob, *, act_dim, rew_dim, split_layer2):
    B = state.shape[0]
    D = state.shape[1] + preference.shape[1]
    d_pad = _round_up(D, 16)                          # bf16 sublane alignment
    assert act_dim + rew_dim <= OUT_PAD, "act_dim + rew_dim must be <= 128"
    assert w_blob.shape == (d_pad + 2 * FUSED, FUSED)
    assert b_blob.shape == (8, FUSED)

    # batch tiling: single block for small B, 256-row tiles for large B
    TB = MAX_TB if B > MAX_TB else _round_up(B, 8)
    B_pad = _round_up(B, TB)

    # fold the concat in here (one small bf16 input DMA), pad to (B_pad, d_pad)
    x = jnp.concatenate([state, preference], axis=1).astype(jnp.bfloat16)
    x = jnp.pad(x, ((0, B_pad - B), (0, d_pad - D)))

    grid = (B_pad // TB,)

    flops = 2 * B_pad * (d_pad * FUSED + FUSED * FUSED + FUSED * OUT_PAD)
    bytes_accessed = (x.size * x.dtype.itemsize
                      + w_blob.size * w_blob.dtype.itemsize
                      + b_blob.size * b_blob.dtype.itemsize
                      + B_pad * OUT_PAD * 4)

    kernel = functools.partial(_fused_actor_critic_kernel,
                               d_pad=d_pad, split_layer2=split_layer2)

    out = pl.pallas_call(
        kernel,
        out_shape=jax.ShapeDtypeStruct((B_pad, OUT_PAD), jnp.float32),
        grid=grid,
        in_specs=[
            pl.BlockSpec((TB, d_pad), lambda i: (i, 0)),         # activations: tiled over batch
            pl.BlockSpec(w_blob.shape, lambda i: (0, 0)),        # weights: VMEM-resident
            pl.BlockSpec(b_blob.shape, lambda i: (0, 0)),        # biases:  VMEM-resident
        ],
        out_specs=pl.BlockSpec((TB, OUT_PAD), lambda i: (i, 0)),
        cost_estimate=pl.CostEstimate(
            flops=flops, transcendentals=0, bytes_accessed=bytes_accessed),
        compiler_params=pltpu.CompilerParams(
            dimension_semantics=("parallel",),                   # 2 TCs on v7x
            vmem_limit_bytes=8 << 20,
        ),
    )(x, w_blob, b_blob)

    policy = out[:B, :act_dim]
    value = out[:B, act_dim:act_dim + rew_dim]
    return policy, value


def rocket_actor_critic_forward(state, preference, fused, *, act_dim, rew_dim):
    """state: [B, obs], preference: [B, rew] -> (policy [B, act], value [B, rew])."""
    return _forward_impl(state, preference, fused["w"], fused["b"],
                         act_dim=act_dim, rew_dim=rew_dim,
                         split_layer2=_mxu_is_128x128())


# ------------------------- parameter construction ---------------------------

def _kaiming_uniform(key, fan_in, fan_out):
    # torch.nn.init.kaiming_uniform_ defaults: a=0, fan_in mode, leaky_relu gain
    bound = (2.0 ** 0.5) * ((3.0 / fan_in) ** 0.5)
    # stored as [in, out] (transposed vs. PyTorch's [out, in])
    return jax.random.uniform(key, (fan_in, fan_out), jnp.float32, -bound, bound)


def init_params(key, obs_dim, act_dim, rew_dim):
    d = obs_dim + rew_dim
    keys = jax.random.split(key, 6)
    return {
        # actor: Linear(d,128), Linear(128,128), Linear(128, act_dim)
        "aw1": _kaiming_uniform(keys[0], d, HID), "ab1": jnp.zeros((1, HID), jnp.float32),
        "aw2": _kaiming_uniform(keys[1], HID, HID), "ab2": jnp.zeros((1, HID), jnp.float32),
        "aw3": _kaiming_uniform(keys[2], HID, act_dim), "ab3": jnp.zeros((1, act_dim), jnp.float32),
        # critic: Linear(d,128), Linear(128,128), Linear(128, rew_dim)
        "cw1": _kaiming_uniform(keys[3], d, HID), "cb1": jnp.zeros((1, HID), jnp.float32),
        "cw2": _kaiming_uniform(keys[4], HID, HID), "cb2": jnp.zeros((1, HID), jnp.float32),
        "cw3": _kaiming_uniform(keys[5], HID, rew_dim), "cb3": jnp.zeros((1, rew_dim), jnp.float32),
    }


def make_fused_params(params, obs_dim, act_dim, rew_dim):
    """Pack all 6 weight matrices into ONE bf16 blob and all biases into ONE f32 blob."""
    A, R = act_dim, rew_dim
    assert A + R <= OUT_PAD, f"act_dim + rew_dim = {A + R} exceeds fused output width {OUT_PAD}"
    D = obs_dim + rew_dim
    d_pad = _round_up(D, 16)

    # layer 1: [aw1 | cw1], rows padded D -> d_pad
    w1 = jnp.zeros((d_pad, FUSED), jnp.float32)
    w1 = w1.at[:D, :HID].set(params["aw1"]).at[:D, HID:].set(params["cw1"])

    # layer 2: block-diagonal [256, 256]
    w2 = jnp.zeros((FUSED, FUSED), jnp.float32)
    w2 = w2.at[:HID, :HID].set(params["aw2"]).at[HID:, HID:].set(params["cw2"])

    # layer 3: block-diagonal, lane-padded; only cols 0:OUT_PAD are ever read
    w3 = jnp.zeros((FUSED, FUSED), jnp.float32)
    w3 = w3.at[:HID, :A].set(params["aw3"]).at[HID:, A:A + R].set(params["cw3"])

    w_blob = jnp.concatenate([w1, w2, w3], axis=0).astype(jnp.bfloat16)  # [d_pad+512, 256]

    bias = jnp.zeros((8, FUSED), jnp.float32)
    bias = bias.at[0, :HID].set(params["ab1"][0]).at[0, HID:].set(params["cb1"][0])
    bias = bias.at[1, :HID].set(params["ab2"][0]).at[1, HID:].set(params["cb2"][0])
    bias = bias.at[2, :A].set(params["ab3"][0]).at[2, A:A + R].set(params["cb3"][0])

    return {"w": w_blob, "b": bias}


# ------------------------------ reference -----------------------------------

def _reference_forward(state, preference, params):
    """Pure-JAX reference of the PyTorch forward, applying the SAME bf16 rounding
    to weights and matmul operands as the kernel (f32 accumulation, f32 biases)."""
    qa = lambda a: a.astype(jnp.bfloat16)
    qw = lambda w: w.astype(jnp.bfloat16)
    x = jnp.concatenate([state, preference], axis=1)

    def mlp(x, w1, b1, w2, b2, w3, b3):
        h = jnp.dot(qa(x), qw(w1), preferred_element_type=jnp.float32) + b1
        h = jnp.maximum(h, NEG_SLOPE * h)
        h = jnp.dot(qa(h), qw(w2), preferred_element_type=jnp.float32) + b2
        h = jnp.maximum(h, NEG_SLOPE * h)
        return jnp.dot(qa(h), qw(w3), preferred_element_type=jnp.float32) + b3

    policy = mlp(x, params["aw1"], params["ab1"], params["aw2"], params["ab2"],
                 params["aw3"], params["ab3"])
    value = mlp(x, params["cw1"], params["cb1"], params["cw2"], params["cb2"],
                params["cw3"], params["cb3"])
    return policy, value


if __name__ == "__main__":
    OBS, ACT, REW = 24, 8, 8   # observation_shape, action_shape, reward_shape

    key = jax.random.PRNGKey(0)
    k_params, k_state, k_pref = jax.random.split(key, 3)

    params = init_params(k_params, OBS, ACT, REW)
    fused = make_fused_params(params, OBS, ACT, REW)

    # --- small batch: single grid step, block == full array ---
    B = 8
    state = jax.random.normal(k_state, (B, OBS), jnp.float32)
    preference = jax.random.normal(k_pref, (B, REW), jnp.float32)

    policy, value = rocket_actor_critic_forward(
        state, preference, fused, act_dim=ACT, rew_dim=REW)
    jax.block_until_ready((policy, value))

    ref_policy, ref_value = _reference_forward(state, preference, params)
    assert policy.shape == (B, ACT) and value.shape == (B, REW)
    assert jnp.allclose(policy, ref_policy, atol=2e-3, rtol=2e-3)
    assert jnp.allclose(value, ref_value, atol=2e-3, rtol=2e-3)

    # --- larger ragged batch: exercises the batch grid + padding path ---
    B2 = 300
    k_s2, k_p2 = jax.random.split(jax.random.PRNGKey(1))
    state2 = jax.random.normal(k_s2, (B2, OBS), jnp.float32)
    pref2 = jax.random.normal(k_p2, (B2, REW), jnp.float32)

    policy2, value2 = rocket_actor_critic_forward(
        state2, pref2, fused, act_dim=ACT, rew_dim=REW)
    jax.block_until_ready((policy2, value2))

    ref_p2, ref_v2 = _reference_forward(state2, pref2, params)
    assert policy2.shape == (B2, ACT) and value2.shape == (B2, REW)
    assert jnp.allclose(policy2, ref_p2, atol=2e-3, rtol=2e-3)
    assert jnp.allclose(value2, ref_v2, atol=2e-3, rtol=2e-3)

    print("KERNEL_OK")
</pallas_src>

<mosaic_0001>
module attributes {stable_mosaic.version = 11 : i64} {
  func.func @_fused_actor_critic_kernel(%arg0: i32, %arg1: memref<8x32xbf16, #tpu.memory_space<vmem>>, %arg2: memref<544x256xbf16, #tpu.memory_space<vmem>>, %arg3: memref<8x256xf32, #tpu.memory_space<vmem>>, %arg4: memref<8x128xf32, #tpu.memory_space<vmem>>) attributes {dimension_semantics = [#tpu.dimension_semantics<parallel>], iteration_bounds = array<i64: 1>, scalar_prefetch = 0 : i64, scratch_operands = 0 : i64, tpu.core_type = #tpu.core_type<tc>, window_params = [{transform_indices = @transform_0, window_bounds = array<i64: 8, 32>}, {pipeline_mode = #tpu.pipeline_mode<synchronous>, transform_indices = @transform_1, window_bounds = array<i64: 544, 256>}, {pipeline_mode = #tpu.pipeline_mode<synchronous>, transform_indices = @transform_2, window_bounds = array<i64: 8, 256>}, {transform_indices = @transform_3, window_bounds = array<i64: 8, 128>}]} {
    %c0 = arith.constant 0 : index
    %c0_0 = arith.constant 0 : index
    %0 = vector.load %arg3[%c0, %c0_0] : memref<8x256xf32, #tpu.memory_space<vmem>>, vector<8x256xf32>
    %c0_1 = arith.constant 0 : index
    %c0_2 = arith.constant 0 : index
    %1 = vector.load %arg1[%c0_1, %c0_2] : memref<8x32xbf16, #tpu.memory_space<vmem>>, vector<8x32xbf16>
    %c0_3 = arith.constant 0 : index
    %c0_4 = arith.constant 0 : index
    %2 = vector.load %arg2[%c0_3, %c0_4] : memref<544x256xbf16, #tpu.memory_space<vmem>>, vector<32x256xbf16>
    %cst = arith.constant dense<0.000000e+00> : vector<8x256xf32>
    %3 = tpu.matmul %1, %2, %cst {dimension_numbers = #tpu.dot_dimension_numbers<[1], [0], [0], [1], [0, 0, 1, 1], [], []>} : vector<8x32xbf16>, vector<32x256xbf16>, vector<8x256xf32> -> vector<8x256xf32>
    %4 = vector.extract_strided_slice %0 {offsets = [0, 0], sizes = [1, 256], strides = [1, 1]} : vector<8x256xf32> to vector<1x256xf32>
    %5 = vector.shape_cast %4 : vector<1x256xf32> to vector<256xf32>
    %6 = vector.shape_cast %5 : vector<256xf32> to vector<1x256xf32>
    %7 = vector.broadcast %6 : vector<1x256xf32> to vector<8x256xf32>
    %8 = arith.addf %3, %7 : vector<8x256xf32>
    %cst_5 = arith.constant 0.00999999977 : f32
    %9 = vector.broadcast %cst_5 : f32 to vector<8x256xf32>
    %10 = arith.mulf %9, %8 : vector<8x256xf32>
    %11 = arith.maximumf %8, %10 : vector<8x256xf32>
    %12 = arith.truncf %11 : vector<8x256xf32> to vector<8x256xbf16>
    %c32 = arith.constant 32 : index
    %c0_6 = arith.constant 0 : index
    %13 = vector.load %arg2[%c32, %c0_6] : memref<544x256xbf16, #tpu.memory_space<vmem>>, vector<256x256xbf16>
    %cst_7 = arith.constant dense<0.000000e+00> : vector<8x256xf32>
    %14 = tpu.matmul %12, %13, %cst_7 {dimension_numbers = #tpu.dot_dimension_numbers<[1], [0], [0], [1], [0, 0, 1, 1], [], []>} : vector<8x256xbf16>, vector<256x256xbf16>, vector<8x256xf32> -> vector<8x256xf32>
    %15 = vector.extract_strided_slice %0 {offsets = [1, 0], sizes = [1, 256], strides = [1, 1]} : vector<8x256xf32> to vector<1x256xf32>
    %16 = vector.shape_cast %15 : vector<1x256xf32> to vector<256xf32>
    %17 = vector.shape_cast %16 : vector<256xf32> to vector<1x256xf32>
    %18 = vector.broadcast %17 : vector<1x256xf32> to vector<8x256xf32>
    %19 = arith.addf %14, %18 : vector<8x256xf32>
    %cst_8 = arith.constant 0.00999999977 : f32
    %20 = vector.broadcast %cst_8 : f32 to vector<8x256xf32>
    %21 = arith.mulf %20, %19 : vector<8x256xf32>
    %22 = arith.maximumf %19, %21 : vector<8x256xf32>
    %23 = arith.truncf %22 : vector<8x256xf32> to vector<8x256xbf16>
    %c288 = arith.constant 288 : index
    %c0_9 = arith.constant 0 : index
    %24 = vector.load %arg2[%c288, %c0_9] : memref<544x256xbf16, #tpu.memory_space<vmem>>, vector<256x128xbf16>
    %cst_10 = arith.constant dense<0.000000e+00> : vector<8x128xf32>
    %25 = tpu.matmul %23, %24, %cst_10 {dimension_numbers = #tpu.dot_dimension_numbers<[1], [0], [0], [1], [0, 0, 1, 1], [], []>} : vector<8x256xbf16>, vector<256x128xbf16>, vector<8x128xf32> -> vector<8x128xf32>
    %26 = vector.extract_strided_slice %0 {offsets = [2, 0], sizes = [1, 128], strides = [1, 1]} : vector<8x256xf32> to vector<1x128xf32>
    %27 = vector.shape_cast %26 : vector<1x128xf32> to vector<128xf32>
    %28 = vector.shape_cast %27 : vector<128xf32> to vector<1x128xf32>
    %29 = vector.broadcast %28 : vector<1x128xf32> to vector<8x128xf32>
    %30 = arith.addf %25, %29 : vector<8x128xf32>
    %c0_11 = arith.constant 0 : index
    %c0_12 = arith.constant 0 : index
    %31 = vector.load %arg4[%c0_11, %c0_12] : memref<8x128xf32, #tpu.memory_space<vmem>>, vector<8x128xf32>
    tpu.vector_store %arg4[%c0_11, %c0_12], %30 {strides = array<i32>} : memref<8x128xf32, #tpu.memory_space<vmem>>, vector<8x128xf32>,
    return
  }
  func.func @transform_0(%arg0: i32) -> (i32, i32) {
    %c0_i32 = arith.constant 0 : i32
    %c0_i32_0 = arith.constant 0 : i32
    return %arg0, %c0_i32 : i32, i32
  }
  func.func @transform_1(%arg0: i32) -> (i32, i32) {
    %c0_i32 = arith.constant 0 : i32
    %c0_i32_0 = arith.constant 0 : i32
    %c0_i32_1 = arith.constant 0 : i32
    return %c0_i32, %c0_i32_0 : i32, i32
  }
  func.func @transform_2(%arg0: i32) -> (i32, i32) {
    %c0_i32 = arith.constant 0 : i32
    %c0_i32_0 = arith.constant 0 : i32
    %c0_i32_1 = arith.constant 0 : i32
    return %c0_i32, %c0_i32_0 : i32, i32
  }
  func.func @transform_3(%arg0: i32) -> (i32, i32) {
    %c0_i32 = arith.constant 0 : i32
    %c0_i32_0 = arith.constant 0 : i32
    return %arg0, %c0_i32 : i32, i32
  }
}

</mosaic_0001>

<bundles_post_ra>
// kernel: _forward_impl.1
= control target key start
LH: loop header
LB: loop body
LE: loop exit
PB: predicated region body
PF: predicated region fallthrough
CT: control target
= control target key end

     0   :  { %8 = vsyncpa [#allocation3], 0  ;;  %s713_s12 = smov [#allocation2]   ;;  %s761_s0 = inlined_call_operand.vmem [shape: bf16[8,32], index: 0, kind: input, shape index: {}]   ;;  %s762_s1 = inlined_call_operand.hbm [shape: bf16[544,256], index: 1, kind: input, shape index: {}]   ;;  %s763_s2 = inlined_call_operand.vmem [shape: f32[8,256], index: 2, kind: input, shape index: {}]   ;;  %s764_s3 = inlined_call_operand.vmem [shape: f32[8,128], index: 3, kind: output, shape index: {}]  }
   0x1   :  { %s16_s13 = sshll.u32 %s713_s12, 4  ;;  %s689_s16 = scalar_lea.hbm %s762_s1, 8704  ;;  %s17_s13 = int_to_ptr.vmem [resolvable:$true] %s16_s13 }
   0x2   :  { %p690_p0 = scmp.ne.s32.totalorder %s762_s1, %s689_s16  ;;  %p693_p1 = scmp.lt.u32.totalorder %s689_s16, %s762_s1 }
   0x4   :  { %p695_p2 = pnand %p693_p1, %p690_p0 }
   0x6   :  { %698 = shalt.err (!%p695_p2)
}
   0x7   :  { %s699_s21 = scalar_lea.vmem %s17_s13, 8704  ;;  %p704_p4 = scmp.lt.s32.totalorder %s17_s13, %s17_s13 }
   0x8   :  { %p700_p3 = scmp.ne.s32.totalorder %s17_s13, %s699_s21  ;;  %p705_p5 = scmp.lt.s32.totalorder %s699_s21, %s699_s21 }
   0xa   :  { %p706_p6 = por %p705_p5, %p704_p4 }
   0xc   :  { %p707_p7 = pnand %p706_p6, %p700_p3 }
   0xe   :  { %710 = shalt.err (!%p707_p7)
}
   0xf   :  { %s714_s22 = smov 128   ;;  %s715_s23 = smov 8  }
  0x10   :  { %22 = dma.hbm_to_vmem [thread:$0]  %s762_s1, 8704, %s17_s13, [#allocation3], %s714_s22, %s714_s22, %s715_s23  }
  0x11   :  { %711 = dma.done.wait [#allocation3], 8704  }
  0x12   :  { %712 = vsyncadd [#allocation3], 4294958592  ;;  %v716_v0 = vmov 0   ;;  %v619_v1 = vld [vmem:[#allocation2 + $0x4] ss:$8 sps:$4 sm:$0xff]   ;;  %vm64_vm0 = vcmask 261120   ;;  %v36_v49 = vlaneseq }
  0x13   :  { %100 = vmatprep.mubr.bf16.mxu0 %v716_v0  ;;  %v621_v2 = vld [vmem:[#allocation2] ss:$8 sps:$4 sm:$0xff]   ;;  %68 = vmatprep.subr.bf16.mxu0 %v619_v1  ;;  %v622_v3 = vld [vmem:[#allocation2 + $0x14] ss:$8 sps:$4 sm:$0xff]   ;;  %v624_v4 = vld [vmem:[#allocation2 + $0x10] ss:$8 sps:$4 sm:$0xff]  }
  0x14   :  { %69 = vmatpush1.bf16.msra.mxu0 %v621_v2  ;;  %v625_v5 = vld [vmem:[#allocation2 + $0x24] ss:$8 sps:$4 sm:$0xff]   ;;  %v627_v6 = vld [vmem:[#allocation2 + $0x20] ss:$8 sps:$4 sm:$0xff]   ;;  %v628_v7 = vld [vmem:[#allocation2 + $0x34] ss:$8 sps:$4 sm:$0xff]  }
  0x15   :  { %70 = vmatprep.subr.bf16.mxu0 %v622_v3  ;;  %315 = vmatprep.subr.bf16.mxu1 %v625_v5  ;;  %v31_v8 = vld [vmem:[%s761_s0] sm:$0xf]  ;;  %v631_v10 = vld [vmem:[#allocation2 + $0x44] ss:$8 sps:$4 sm:$0xff]   ;;  %v633_v11 = vld [vmem:[#allocation2 + $0x40] ss:$8 sps:$4 sm:$0xff]  }
  0x16   :  { %316 = vmatpush1.bf16.msra.mxu1 %v627_v6  ;;  %v630_v9 = vld [vmem:[#allocation2 + $0x30] ss:$8 sps:$4 sm:$0xff]   ;;  %v634_v12 = vld [vmem:[#allocation2 + $0x54] ss:$8 sps:$4 sm:$0xff]   ;;  %v637_v14 = vld [vmem:[#allocation2 + $0x64] ss:$8 sps:$4 sm:$0xff]  }
  0x17   :  { %317 = vmatprep.subr.bf16.mxu1 %v628_v7  ;;  %v636_v13 = vld [vmem:[#allocation2 + $0x50] ss:$8 sps:$4 sm:$0xff]   ;;  %v639_v15 = vld [vmem:[#allocation2 + $0x60] ss:$8 sps:$4 sm:$0xff]   ;;  %v640_v16 = vld [vmem:[#allocation2 + $0x74] ss:$8 sps:$4 sm:$0xff]  }
  0x18   :  { %71 = vmatpush1.bf16.msra.mxu0 %v624_v4  ;;  %v642_v17 = vld [vmem:[#allocation2 + $0x70] ss:$8 sps:$4 sm:$0xff]   ;;  %v643_v18 = vld [vmem:[#allocation2 + $0x84] ss:$8 sps:$4 sm:$0xff]   ;;  %v645_v19 = vld [vmem:[#allocation2 + $0x80] ss:$8 sps:$4 sm:$0xff]  }
  0x19   :  { %v646_v20 = vld [vmem:[#allocation2 + $0x94] ss:$8 sps:$4 sm:$0xff]   ;;  %v648_v21 = vld [vmem:[#allocation2 + $0x90] ss:$8 sps:$4 sm:$0xff]   ;;  %v649_v22 = vld [vmem:[#allocation2 + $0xa4] ss:$8 sps:$4 sm:$0xff]  }
  0x1a   :  { %318 = vmatpush1.bf16.msra.mxu1 %v630_v9  ;;  %v651_v23 = vld [vmem:[#allocation2 + $0xa0] ss:$8 sps:$4 sm:$0xff]   ;;  %v652_v24 = vld [vmem:[#allocation2 + $0xb4] ss:$8 sps:$4 sm:$0xff]   ;;  %v654_v25 = vld [vmem:[#allocation2 + $0xb0] ss:$8 sps:$4 sm:$0xff]  }
  0x1b   :  { %544 = vmatmul.mubr.msk.bf16.vlgmr.msra.gmra.mrb[0].mxu0 %vm64_vm0, %v31_v8  ;;  %319 = vmatprep.subr.bf16.mxu1 %v631_v10  ;;  %v655_v26 = vld [vmem:[#allocation2 + $0xc4] ss:$8 sps:$4 sm:$0xff]   ;;  %v657_v27 = vld [vmem:[#allocation2 + $0xc0] ss:$8 sps:$4 sm:$0xff]   ;;  %v658_v28 = vld [vmem:[#allocation2 + $0xd4] ss:$8 sps:$4 sm:$0xff]  }
  0x1c   :  { %v660_v29 = vld [vmem:[#allocation2 + $0xd0] ss:$8 sps:$4 sm:$0xff]   ;;  %v661_v30 = vld [vmem:[#allocation2 + $0xe4] ss:$8 sps:$4 sm:$0xff]   ;;  %v663_v31 = vld [vmem:[#allocation2 + $0xe0] ss:$8 sps:$4 sm:$0xff]  }
  0x1d   :  { %v664_v32 = vld [vmem:[#allocation2 + $0xf4] ss:$8 sps:$4 sm:$0xff]   ;;  %v666_v33 = vld [vmem:[#allocation2 + $0xf0] ss:$8 sps:$4 sm:$0xff]   ;;  %v667_v34 = vld [vmem:[#allocation2 + $0x104] ss:$8 sps:$4 sm:$0xff]  }
  0x1e   :  { %320 = vmatpush1.bf16.msra.mxu1 %v633_v11  ;;  %v669_v35 = vld [vmem:[#allocation2 + $0x100] ss:$8 sps:$4 sm:$0xff]   ;;  %v670_v36 = vld [vmem:[#allocation2 + $0x114] ss:$8 sps:$4 sm:$0xff]   ;;  %v672_v37 = vld [vmem:[#allocation2 + $0x110] ss:$8 sps:$4 sm:$0xff]  }
  0x1f   :  { %321 = vmatprep.subr.bf16.mxu1 %v634_v12  ;;  %v673_v38 = vld [vmem:[#allocation2 + $0x1a0] ss:$8 sps:$4 sm:$0xff]   ;;  %v675_v40 = vld [vmem:[#allocation2 + $0x1b0] ss:$8 sps:$4 sm:$0xff]   ;;  %v37_v50 = vshrl.u32 %v36_v49, 7 }
  0x20   :  { %v674_v39 = vld [vmem:[#allocation2 + $0x120] ss:$8 sps:$4 sm:$0xff]   ;;  %593 = vmatprep.subr.bf16.mxu0 %v673_v38  ;;  %v676_v41 = vld [vmem:[#allocation2 + $0x130] ss:$8 sps:$4 sm:$0xff]  }
  0x21   :  { %594 = vmatpush3.bf16.msra.mxu0 %v674_v39  ;;  %v677_v42 = vld [vmem:[#allocation2 + $0x1c0] ss:$8 sps:$4 sm:$0xff]   ;;  %v679_v44 = vld [vmem:[#allocation2 + $0x1d0] ss:$8 sps:$4 sm:$0xff]   ;;  %v38_v51 = vsub.s32 0, %v37_v50  ;;  %v149_v9 = vsub.s32 1, %v37_v50 }
  0x22   :  { %322 = vmatpush1.bf16.msra.mxu1 %v636_v13  ;;  %595 = vmatprep.subr.bf16.mxu0 %v675_v40  ;;  %v678_v43 = vld [vmem:[#allocation2 + $0x140] ss:$8 sps:$4 sm:$0xff]   ;;  %v680_v45 = vld [vmem:[#allocation2 + $0x150] ss:$8 sps:$4 sm:$0xff]  }
  0x23   :  { %323 = vmatprep.subr.bf16.mxu1 %v637_v14  ;;  %v681_v46 = vld [vmem:[#allocation2 + $0x1e0] ss:$8 sps:$4 sm:$0xff]   ;;  %v683_v48 = vld [vmem:[#allocation2 + $0x1f0] ss:$8 sps:$4 sm:$0xff]  }
  0x24   :  { %v682_v47 = vld [vmem:[#allocation2 + $0x160] ss:$8 sps:$4 sm:$0xff]   ;;  %v29_v52 = vld [vmem:[%s763_s2] sm:$0xff]  ;;  %v30_v53 = vld [vmem:[%s763_s2 + $0x8] sm:$0xff] }
  0x25   :  { %596 = vmatpush3.bf16.msra.mxu0 %v676_v41  ;;  %v39_v54 = vrot.slane %v29_v52, %v38_v51  ;;  %v43_v55 = vrot.slane %v30_v53, %v38_v51  ;;  %v684_v4 = vld [vmem:[#allocation2 + $0x170] ss:$8 sps:$4 sm:$0xff]   ;;  %v685_v5 = vld [vmem:[#allocation2 + $0x200] ss:$8 sps:$4 sm:$0xff]   ;;  %v150_v10 = vrot.slane %v29_v52, %v149_v9  ;;  %v154_v11 = vrot.slane %v30_v53, %v149_v9 }
  0x26   :  { %324 = vmatpush1.bf16.msra.mxu1 %v639_v15  ;;  %597 = vmatprep.subr.bf16.mxu0 %v677_v42  ;;  %v686_v6 = vld [vmem:[#allocation2 + $0x180] ss:$8 sps:$4 sm:$0xff]   ;;  %v687_v7 = vld [vmem:[#allocation2 + $0x210] ss:$8 sps:$4 sm:$0xff]  }
  0x27   :  { %325 = vmatprep.subr.bf16.mxu1 %v640_v16  ;;  %v688_v8 = vld [vmem:[#allocation2 + $0x190] ss:$8 sps:$4 sm:$0xff]  }
  0x29   :  { %598 = vmatpush3.bf16.msra.mxu0 %v678_v43 }
  0x2a   :  { %326 = vmatpush1.bf16.msra.mxu1 %v642_v17  ;;  %599 = vmatprep.subr.bf16.mxu0 %v679_v44 }
  0x2b   :  { %327 = vmatprep.subr.bf16.mxu1 %v643_v18 }
  0x2d   :  { %600 = vmatpush3.bf16.msra.mxu0 %v680_v45 }
  0x2e   :  { %328 = vmatpush1.bf16.msra.mxu1 %v645_v19  ;;  %601 = vmatprep.subr.bf16.mxu0 %v681_v46 }
  0x2f   :  { %329 = vmatprep.subr.bf16.mxu1 %v646_v20 }
  0x31   :  { %602 = vmatpush3.bf16.msra.mxu0 %v682_v47 }
  0x32   :  { %330 = vmatpush1.bf16.msra.mxu1 %v648_v21  ;;  %603 = vmatprep.subr.bf16.mxu0 %v683_v48 }
  0x33   :  { %331 = vmatprep.subr.bf16.mxu1 %v649_v22 }
  0x35   :  { %604 = vmatpush3.bf16.msra.mxu0 %v684_v4 }
  0x36   :  { %332 = vmatpush1.bf16.msra.mxu1 %v651_v23  ;;  %605 = vmatprep.subr.bf16.mxu0 %v685_v5 }
  0x37   :  { %333 = vmatprep.subr.bf16.mxu1 %v652_v24  ;;  %v396_v24 = vsub.s32 2, %v37_v50 }
  0x39   :  { %606 = vmatpush3.bf16.msra.mxu0 %v686_v6 }
  0x3a   :  { %334 = vmatpush1.bf16.msra.mxu1 %v654_v25  ;;  %607 = vmatprep.subr.bf16.mxu0 %v687_v7 }
  0x3b   :  { %335 = vmatprep.subr.bf16.mxu1 %v655_v26  ;;  %v397_v26 = vrot.slane %v29_v52, %v396_v24 }
  0x3d   :  { %608 = vmatpush3.bf16.msra.mxu0 %v688_v8 }
  0x3e   :  { %336 = vmatpush1.bf16.msra.mxu1 %v657_v27 }
  0x3f   :  { %337 = vmatprep.subr.bf16.mxu1 %v658_v28 }
  0x42   :  { %338 = vmatpush1.bf16.msra.mxu1 %v660_v29 }
  0x43   :  { %339 = vmatprep.subr.bf16.mxu1 %v661_v30 }
  0x46   :  { %340 = vmatpush1.bf16.msra.mxu1 %v663_v31 }
  0x47   :  { %341 = vmatprep.subr.bf16.mxu1 %v664_v32 }
  0x4a   :  { %342 = vmatpush1.bf16.msra.mxu1 %v666_v33 }
  0x4b   :  { %343 = vmatprep.subr.bf16.mxu1 %v667_v34 }
  0x4e   :  { %344 = vmatpush1.bf16.msra.mxu1 %v669_v35 }
  0x4f   :  { %345 = vmatprep.subr.bf16.mxu1 %v670_v36 }
  0x52   :  { %346 = vmatpush1.bf16.msra.mxu1 %v672_v37 }
  0xee   :  { %v102_v56 = vpop.f32.mrb[0].mxu0 }
  0xef   :  { %v103_v57 = vadd.f32 %v102_v56, %v39_v54  ;;  %v104_v58 = vpop.f32.mrb[1].mxu0 }
  0xf0   :  { %v105_v59 = vadd.f32 %v104_v58, %v43_v55  ;;  %v106_v60 = vpop.f32.mrb[2].mxu0 }
  0xf1   :  { %v109_v61 = vmul.f32 0.01, %v103_v57  ;;  %v107_v62 = vpop.f32.mrb[3].mxu0 }
  0xf2   :  { %v110_v63 = vmul.f32 0.01, %v105_v59 }
  0xf3   :  { %v111_v0 = vmax.f32 %v103_v57, %v109_v61 }
  0xf4   :  { %v112_v1 = vmax.f32 %v105_v59, %v110_v63 }
  0xf5   :  { %v113_v3 = vpack.c.bf16 %v111_v0, %v111_v0 }
  0xf6   :  { %v114_v2 = vpack.c.bf16 %v112_v1, %v112_v1 }
  0xf8   :  { %347 = vmatprep.mubr.bf16.mxu1 %v114_v2 }
  0xf9   :  { %348 = vmatmul.mubr.bf16.vlgmr.msra.gmra.mrb[0].mxu1 %v113_v3 }
 0x1cc   :  { %v349_v12 = vpop.f32.mrb[0].mxu1 }
 0x1cd   :  { %v350_v13 = vadd.f32 %v349_v12, %v150_v10  ;;  %v351_v14 = vpop.f32.mrb[1].mxu1 }
 0x1ce   :  { %v352_v15 = vadd.f32 %v351_v14, %v154_v11  ;;  %v353_v16 = vpop.f32.mrb[2].mxu1 }
 0x1cf   :  { %v356_v17 = vmul.f32 0.01, %v350_v13  ;;  %v354_v18 = vpop.f32.mrb[3].mxu1 }
 0x1d0   :  { %v357_v19 = vmul.f32 0.01, %v352_v15 }
 0x1d1   :  { %v358_v20 = vmax.f32 %v350_v13, %v356_v17 }
 0x1d2   :  { %v359_v21 = vmax.f32 %v352_v15, %v357_v19 }
 0x1d3   :  { %v360_v23 = vpack.c.bf16 %v358_v20, %v358_v20 }
 0x1d4   :  { %v361_v22 = vpack.c.bf16 %v359_v21, %v359_v21 }
 0x1d6   :  { %526 = vmatprep.mubr.bf16.mxu0 %v361_v22 }
 0x1d7   :  { %527 = vmatmul.mubr.bf16.vlgmr.msra.gmra.mrb[4].mxu0 %v360_v23 }
 0x2aa   :  { %v609_v25 = vpop.f32.mrb[4].mxu0 }
 0x2ab   :  { %v610_v27 = vpop.f32.mrb[5].mxu0 }
 0x2ac   :  { %v611_v28 = vadd.f32 %v610_v27, %v609_v25  ;;  %v612_v29 = vpop.f32.mrb[6].mxu0 }
 0x2ad   :  { %v613_v30 = vpop.f32.mrb[7].mxu0 }
 0x2ae   :  { %v529_v31 = vadd.f32 %v611_v28, %v397_v26 }
 0x2b0   :  { %534 = vst [vmem:[%s764_s3] sm:$0xff] %v529_v31 }
 0x2b1   :  { %539 = vsyncpa [#allocation3], 1 }

</bundles_post_ra>
